<compile_context>
chip_gen: v7x
topology: tpu7x:2x2x1
jax: 0.10.0
libtpu: 0.0.40
codegen_flags: <defaults>
</compile_context>

<pallas_src>
import jax
import jax.numpy as jnp
from jax.experimental import pallas as pl
from jax.experimental.pallas import tpu as pltpu

# Small but TPU-friendly shapes: feature dims are multiples of 128 (lane
# aligned), batch is a multiple of 8 sublanes and large enough to tile.
BATCH = 256
IN_F = 128
HID_F = 128
OUT_F = 16          # true module output width (written directly, no padding)


def _pick_batch_tile(batch):
    """grid=1 on single-TC chips (v5e/v6e); 2 batch tiles on dual-TC v7x."""
    try:
        kind = jax.devices()[0].device_kind.lower()
    except Exception:
        kind = ""
    if "v7" in kind and batch % 2 == 0 and batch // 2 >= 8:
        return batch // 2
    return batch


TB = _pick_batch_tile(BATCH)


def mlp_kernel(x_ref, w1_ref, b1_ref, w2_ref, b2_ref, o_ref):
    # Linear 1: bf16 operands, f32 accumulation on the MXU.  The x cast stays
    # in-kernel (VPU work hidden under the input DMA).
    x_bf = x_ref[...].astype(jnp.bfloat16)
    h = jnp.dot(x_bf, w1_ref[...], preferred_element_type=jnp.float32)
    # Bias + ReLU in f32 on the VPU (v5e has no bf16 VPU).
    h = jnp.maximum(h + b1_ref[...], 0.0)
    # Linear 2: bf16 operands, f32 accumulation; direct (TB, OUT_F) store.
    out = jnp.dot(h.astype(jnp.bfloat16), w2_ref[...],
                  preferred_element_type=jnp.float32)
    o_ref[...] = (out + b2_ref[...]).astype(o_ref.dtype)


def prepare_params(w1, b1, w2, b2):
    """One-time parameter prep, hoisted out of the per-call path.

    Weights -> bf16 (MXU-native operands, halves weight HBM traffic),
    biases  -> (1, F) f32 rows for clean in-kernel broadcast.
    """
    return (w1.astype(jnp.bfloat16),
            b1.reshape(1, -1).astype(jnp.float32),
            w2.astype(jnp.bfloat16),
            b2.reshape(1, -1).astype(jnp.float32))


@jax.jit
def my_sequential_forward(x, w1_bf, b1_2d, w2_bf, b2_2d):
    """Fused Linear -> ReLU -> Linear forward.

    x     : (B, IN_F) float32
    w1_bf : (IN_F, HID_F) bf16,  b1_2d: (1, HID_F) f32
    w2_bf : (HID_F, OUT_F) bf16, b2_2d: (1, OUT_F) f32
    returns (B, OUT_F) float32
    """
    B, in_f = x.shape
    hid_f = w1_bf.shape[1]
    out_f = w2_bf.shape[1]
    tb = TB if (B % TB == 0) else B
    grid = (pl.cdiv(B, tb),)

    cost = pl.CostEstimate(
        flops=2 * B * in_f * hid_f + 2 * B * hid_f * out_f,
        transcendentals=0,
        bytes_accessed=(B * in_f * 4 + in_f * hid_f * 2 + hid_f * 4
                        + hid_f * out_f * 2 + out_f * 4 + B * out_f * 4),
    )

    return pl.pallas_call(
        mlp_kernel,
        out_shape=jax.ShapeDtypeStruct((B, out_f), x.dtype),
        grid=grid,
        in_specs=[
            pl.BlockSpec((tb, in_f), lambda i: (i, 0)),      # x: tiled over batch
            pl.BlockSpec((in_f, hid_f), lambda i: (0, 0)),   # w1: VMEM-resident
            pl.BlockSpec((1, hid_f), lambda i: (0, 0)),      # b1: resident
            pl.BlockSpec((hid_f, out_f), lambda i: (0, 0)),  # w2: resident
            pl.BlockSpec((1, out_f), lambda i: (0, 0)),      # b2: resident
        ],
        # Last block dim (OUT_F=16) equals the full array dim -> legal block,
        # and no padded columns / follow-up slice are needed.
        out_specs=pl.BlockSpec((tb, out_f), lambda i: (i, 0)),
        compiler_params=pltpu.CompilerParams(
            dimension_semantics=("parallel",),
        ),
        cost_estimate=cost,
    )(x, w1_bf, b1_2d, w2_bf, b2_2d)


def reference_forward(x, w1, b1, w2, b2):
    h = jnp.maximum(x @ w1 + b1, 0.0)
    return h @ w2 + b2


if __name__ == "__main__":
    key = jax.random.PRNGKey(0)
    kx, kw1, kb1, kw2, kb2 = jax.random.split(key, 5)

    x = jax.random.normal(kx, (BATCH, IN_F), dtype=jnp.float32)
    # Deterministic synthetic parameters (roughly PyTorch-default scale).
    w1 = jax.random.uniform(kw1, (IN_F, HID_F), dtype=jnp.float32,
                            minval=-1.0, maxval=1.0) / jnp.sqrt(IN_F)
    b1 = jax.random.uniform(kb1, (HID_F,), dtype=jnp.float32,
                            minval=-1.0, maxval=1.0) / jnp.sqrt(IN_F)
    w2 = jax.random.uniform(kw2, (HID_F, OUT_F), dtype=jnp.float32,
                            minval=-1.0, maxval=1.0) / jnp.sqrt(HID_F)
    b2 = jax.random.uniform(kb2, (OUT_F,), dtype=jnp.float32,
                            minval=-1.0, maxval=1.0) / jnp.sqrt(HID_F)

    # Parameter prep is done once (not per forward).
    w1_bf, b1_2d, w2_bf, b2_2d = prepare_params(w1, b1, w2, b2)

    out = my_sequential_forward(x, w1_bf, b1_2d, w2_bf, b2_2d)
    out = jax.block_until_ready(out)

    ref = reference_forward(x, w1, b1, w2, b2)
    assert out.shape == (BATCH, OUT_F)
    # bf16 matmul operands with f32 accumulation -> looser tolerance vs f32 ref.
    assert jnp.allclose(out, ref, atol=3e-2, rtol=3e-2), "mismatch vs reference"

    print("KERNEL_OK")
</pallas_src>

<mosaic_0001>
module attributes {stable_mosaic.version = 11 : i64} {
  func.func @mlp_kernel(%arg0: i32, %arg1: memref<256x128xf32, #tpu.memory_space<vmem>>, %arg2: memref<128x128xbf16, #tpu.memory_space<vmem>>, %arg3: memref<1x128xf32, #tpu.memory_space<vmem>>, %arg4: memref<128x16xbf16, #tpu.memory_space<vmem>>, %arg5: memref<1x16xf32, #tpu.memory_space<vmem>>, %arg6: memref<256x16xf32, #tpu.memory_space<vmem>>) attributes {dimension_semantics = [#tpu.dimension_semantics<parallel>], iteration_bounds = array<i64: 1>, scalar_prefetch = 0 : i64, scratch_operands = 0 : i64, tpu.core_type = #tpu.core_type<tc>, window_params = [{transform_indices = @transform_0, window_bounds = array<i64: 256, 128>}, {pipeline_mode = #tpu.pipeline_mode<synchronous>, transform_indices = @transform_1, window_bounds = array<i64: 128, 128>}, {pipeline_mode = #tpu.pipeline_mode<synchronous>, transform_indices = @transform_2, window_bounds = array<i64: 1, 128>}, {pipeline_mode = #tpu.pipeline_mode<synchronous>, transform_indices = @transform_3, window_bounds = array<i64: 128, 16>}, {pipeline_mode = #tpu.pipeline_mode<synchronous>, transform_indices = @transform_4, window_bounds = array<i64: 1, 16>}, {transform_indices = @transform_5, window_bounds = array<i64: 256, 16>}]} {
    %c0 = arith.constant 0 : index
    %c0_0 = arith.constant 0 : index
    %0 = vector.load %arg1[%c0, %c0_0] : memref<256x128xf32, #tpu.memory_space<vmem>>, vector<256x128xf32>
    %1 = arith.truncf %0 : vector<256x128xf32> to vector<256x128xbf16>
    %c0_1 = arith.constant 0 : index
    %c0_2 = arith.constant 0 : index
    %2 = vector.load %arg2[%c0_1, %c0_2] : memref<128x128xbf16, #tpu.memory_space<vmem>>, vector<128x128xbf16>
    %cst = arith.constant dense<0.000000e+00> : vector<256x128xf32>
    %3 = tpu.matmul %1, %2, %cst {dimension_numbers = #tpu.dot_dimension_numbers<[1], [0], [0], [1], [0, 0, 1, 1], [], []>} : vector<256x128xbf16>, vector<128x128xbf16>, vector<256x128xf32> -> vector<256x128xf32>
    %c0_3 = arith.constant 0 : index
    %c0_4 = arith.constant 0 : index
    %4 = vector.load %arg3[%c0_3, %c0_4] : memref<1x128xf32, #tpu.memory_space<vmem>>, vector<1x128xf32>
    %5 = vector.broadcast %4 : vector<1x128xf32> to vector<256x128xf32>
    %6 = arith.addf %3, %5 : vector<256x128xf32>
    %cst_5 = arith.constant 0.000000e+00 : f32
    %7 = vector.broadcast %cst_5 : f32 to vector<256x128xf32>
    %8 = arith.maximumf %6, %7 : vector<256x128xf32>
    %9 = arith.truncf %8 : vector<256x128xf32> to vector<256x128xbf16>
    %c0_6 = arith.constant 0 : index
    %c0_7 = arith.constant 0 : index
    %10 = vector.load %arg4[%c0_6, %c0_7] : memref<128x16xbf16, #tpu.memory_space<vmem>>, vector<128x16xbf16>
    %cst_8 = arith.constant dense<0.000000e+00> : vector<256x16xf32>
    %11 = tpu.matmul %9, %10, %cst_8 {dimension_numbers = #tpu.dot_dimension_numbers<[1], [0], [0], [1], [0, 0, 1, 1], [], []>} : vector<256x128xbf16>, vector<128x16xbf16>, vector<256x16xf32> -> vector<256x16xf32>
    %c0_9 = arith.constant 0 : index
    %c0_10 = arith.constant 0 : index
    %12 = vector.load %arg5[%c0_9, %c0_10] : memref<1x16xf32, #tpu.memory_space<vmem>>, vector<1x16xf32>
    %13 = vector.broadcast %12 : vector<1x16xf32> to vector<256x16xf32>
    %14 = arith.addf %11, %13 : vector<256x16xf32>
    %c0_11 = arith.constant 0 : index
    %c0_12 = arith.constant 0 : index
    %15 = vector.load %arg6[%c0_11, %c0_12] : memref<256x16xf32, #tpu.memory_space<vmem>>, vector<256x16xf32>
    tpu.vector_store %arg6[%c0_11, %c0_12], %14 {strides = array<i32>} : memref<256x16xf32, #tpu.memory_space<vmem>>, vector<256x16xf32>,
    return
  }
  func.func @transform_0(%arg0: i32) -> (i32, i32) {
    %c0_i32 = arith.constant 0 : i32
    %c0_i32_0 = arith.constant 0 : i32
    return %arg0, %c0_i32 : i32, i32
  }
  func.func @transform_1(%arg0: i32) -> (i32, i32) {
    %c0_i32 = arith.constant 0 : i32
    %c0_i32_0 = arith.constant 0 : i32
    %c0_i32_1 = arith.constant 0 : i32
    return %c0_i32, %c0_i32_0 : i32, i32
  }
  func.func @transform_2(%arg0: i32) -> (i32, i32) {
    %c0_i32 = arith.constant 0 : i32
    %c0_i32_0 = arith.constant 0 : i32
    %c0_i32_1 = arith.constant 0 : i32
    return %c0_i32, %c0_i32_0 : i32, i32
  }
  func.func @transform_3(%arg0: i32) -> (i32, i32) {
    %c0_i32 = arith.constant 0 : i32
    %c0_i32_0 = arith.constant 0 : i32
    %c0_i32_1 = arith.constant 0 : i32
    return %c0_i32, %c0_i32_0 : i32, i32
  }
  func.func @transform_4(%arg0: i32) -> (i32, i32) {
    %c0_i32 = arith.constant 0 : i32
    %c0_i32_0 = arith.constant 0 : i32
    %c0_i32_1 = arith.constant 0 : i32
    return %c0_i32, %c0_i32_0 : i32, i32
  }
  func.func @transform_5(%arg0: i32) -> (i32, i32) {
    %c0_i32 = arith.constant 0 : i32
    %c0_i32_0 = arith.constant 0 : i32
    return %arg0, %c0_i32 : i32, i32
  }
}

</mosaic_0001>

<bundles_post_ra>
// kernel: my_sequential_forward.1
= control target key start
LH: loop header
LB: loop body
LE: loop exit
PB: predicated region body
PF: predicated region fallthrough
CT: control target
= control target key end

     0   :  { %10 = vsyncpa [#allocation3], 0  ;;  %s838_s18 = smov [#allocation2]   ;;  %s1133_s0 = inlined_call_operand.hbm [shape: f32[256,128], index: 0, kind: input, shape index: {}]   ;;  %s1134_s1 = inlined_call_operand.vmem [shape: bf16[128,128], index: 1, kind: input, shape index: {}]   ;;  %s1135_s2 = inlined_call_operand.vmem [shape: f32[1,128], index: 2, kind: input, shape index: {}]   ;;  %s1136_s3 = inlined_call_operand.vmem [shape: bf16[128,16], index: 3, kind: input, shape index: {}]   ;;  %s1137_s4 = inlined_call_operand.vmem [shape: f32[1,16], index: 4, kind: input, shape index: {}]   ;;  %s1138_s5 = inlined_call_operand.vmem [shape: f32[256,16], index: 5, kind: output, shape index: {}]  }
   0x1   :  { %s16_s19 = sshll.u32 %s838_s18, 4  ;;  %s814_s22 = scalar_lea.hbm %s1133_s0, 4096  ;;  %s17_s19 = int_to_ptr.vmem [resolvable:$true] %s16_s19 }
   0x2   :  { %p815_p0 = scmp.ne.s32.totalorder %s1133_s0, %s814_s22  ;;  %p818_p1 = scmp.lt.u32.totalorder %s814_s22, %s1133_s0 }
   0x4   :  { %p820_p2 = pnand %p818_p1, %p815_p0 }
   0x6   :  { %823 = shalt.err (!%p820_p2)
}
   0x7   :  { %s824_s27 = scalar_lea.vmem %s17_s19, 4096  ;;  %p829_p4 = scmp.lt.s32.totalorder %s17_s19, %s17_s19 }
   0x8   :  { %p825_p3 = scmp.ne.s32.totalorder %s17_s19, %s824_s27  ;;  %p830_p5 = scmp.lt.s32.totalorder %s824_s27, %s824_s27 }
   0xa   :  { %p831_p6 = por %p830_p5, %p829_p4 }
   0xc   :  { %p832_p7 = pnand %p831_p6, %p825_p3 }
   0xe   :  { %835 = shalt.err (!%p832_p7)
}
   0xf   :  { %s839_s28 = smov 128   ;;  %s840_s29 = smov 8  }
  0x10   :  { %22 = dma.hbm_to_vmem [thread:$0]  %s1133_s0, 4096, %s17_s19, [#allocation3], %s839_s28, %s839_s28, %s840_s29  }
  0x11   :  { %836 = dma.done.wait [#allocation3], 4096  }
  0x12   :  { %837 = vsyncadd [#allocation3], 4294963200  ;;  %v798_v0 = vld [vmem:[%s1134_s1] sm:$0xff]   ;;  %v799_v1 = vld [vmem:[%s1134_s1 + $0x8] sm:$0xff]   ;;  %vm595_vm0 = vcmask 130048  }
  0x13   :  { %699 = vmatprep.subr.bf16.mxu0 %v798_v0  ;;  %v800_v2 = vld [vmem:[%s1134_s1 + $0x10] sm:$0xff]   ;;  %v801_v3 = vld [vmem:[%s1134_s1 + $0x18] sm:$0xff]   ;;  %v35_v4 = vld [vmem:[#allocation2] sm:$0xff] }
  0x14   :  { %700 = vmatpush3.bf16.msra.mxu0 %v798_v0  ;;  %v36_v5 = vld [vmem:[#allocation2 + $0x8] sm:$0xff]  ;;  %v802_v7 = vld [vmem:[%s1134_s1 + $0x20] sm:$0xff]   ;;  %v804_v9 = vld [vmem:[%s1134_s1 + $0x30] sm:$0xff]  }
  0x15   :  { %701 = vmatprep.subr.bf16.mxu0 %v799_v1  ;;  %v67_v6 = vpack.c.bf16 %v36_v5, %v35_v4  ;;  %v803_v8 = vld [vmem:[%s1134_s1 + $0x28] sm:$0xff]   ;;  %v806_v10 = vld [vmem:[%s1136_s3] sm:$0xff]   ;;  %v808_v12 = vld [vmem:[%s1136_s3 + $0x10] sm:$0xff]  }
  0x16   :  { %v807_v11 = vld [vmem:[%s1136_s3 + $0x8] sm:$0xff]   ;;  %747 = vmatprep.subr.bf16.mxu1 %v806_v10  ;;  %v805_v13 = vld [vmem:[%s1134_s1 + $0x38] sm:$0xff]   ;;  %v37_v14 = vld [vmem:[#allocation2 + $0x10] sm:$0xff] }
  0x17   :  { %715 = vmatprep.mubr.bf16.mxu0 %v67_v6  ;;  %748 = vmatpush3.bf16.msra.mxu1 %v806_v10  ;;  %v38_v15 = vld [vmem:[#allocation2 + $0x18] sm:$0xff]  ;;  %v39_v17 = vld [vmem:[#allocation2 + $0x20] sm:$0xff]  ;;  %v40_v18 = vld [vmem:[#allocation2 + $0x28] sm:$0xff] }
  0x18   :  { %702 = vmatpush3.bf16.msra.mxu0 %v799_v1  ;;  %749 = vmatprep.subr.bf16.mxu1 %v807_v11  ;;  %v809_v16 = vld [vmem:[%s1136_s3 + $0x18] sm:$0xff]   ;;  %v68_v19 = vpack.c.bf16 %v38_v15, %v37_v14  ;;  %v69_v20 = vpack.c.bf16 %v40_v18, %v39_v17  ;;  %v810_v21 = vld [vmem:[%s1136_s3 + $0x20] sm:$0xff]   ;;  %v41_v22 = vld [vmem:[#allocation2 + $0x30] sm:$0xff] }
  0x19   :  { %703 = vmatprep.subr.bf16.mxu0 %v800_v2  ;;  %v42_v23 = vld [vmem:[#allocation2 + $0x38] sm:$0xff]  ;;  %v811_v24 = vld [vmem:[%s1136_s3 + $0x28] sm:$0xff]   ;;  %v43_v25 = vld [vmem:[#allocation2 + $0x40] sm:$0xff] }
  0x1a   :  { %v44_v26 = vld [vmem:[#allocation2 + $0x48] sm:$0xff]  ;;  %v70_v27 = vpack.c.bf16 %v42_v23, %v41_v22  ;;  %v45_v29 = vld [vmem:[#allocation2 + $0x50] sm:$0xff]  ;;  %v46_v30 = vld [vmem:[#allocation2 + $0x58] sm:$0xff] }
  0x1b   :  { %750 = vmatpush3.bf16.msra.mxu1 %v807_v11  ;;  %v71_v28 = vpack.c.bf16 %v44_v26, %v43_v25  ;;  %v47_v31 = vld [vmem:[#allocation2 + $0x60] sm:$0xff]  ;;  %v48_v32 = vld [vmem:[#allocation2 + $0x68] sm:$0xff]  ;;  %v72_v33 = vpack.c.bf16 %v46_v30, %v45_v29  ;;  %v49_v35 = vld [vmem:[#allocation2 + $0x70] sm:$0xff] }
  0x1c   :  { %704 = vmatpush3.bf16.msra.mxu0 %v800_v2  ;;  %751 = vmatprep.subr.bf16.mxu1 %v808_v12  ;;  %v73_v34 = vpack.c.bf16 %v48_v32, %v47_v31  ;;  %v50_v36 = vld [vmem:[#allocation2 + $0x78] sm:$0xff]  ;;  %v51_v37 = vld [vmem:[#allocation2 + $0x80] sm:$0xff]  ;;  %v52_v38 = vld [vmem:[#allocation2 + $0x88] sm:$0xff] }
  0x1d   :  { %705 = vmatprep.subr.bf16.mxu0 %v801_v3  ;;  %v74_v39 = vpack.c.bf16 %v50_v36, %v49_v35  ;;  %v75_v40 = vpack.c.bf16 %v52_v38, %v51_v37  ;;  %v53_v41 = vld [vmem:[#allocation2 + $0x90] sm:$0xff]  ;;  %v54_v42 = vld [vmem:[#allocation2 + $0x98] sm:$0xff]  ;;  %v55_v43 = vld [vmem:[#allocation2 + $0xa0] sm:$0xff] }
  0x1e   :  { %v56_v44 = vld [vmem:[#allocation2 + $0xa8] sm:$0xff]  ;;  %v76_v45 = vpack.c.bf16 %v54_v42, %v53_v41  ;;  %v57_v47 = vld [vmem:[#allocation2 + $0xb0] sm:$0xff]  ;;  %v58_v48 = vld [vmem:[#allocation2 + $0xb8] sm:$0xff] }
  0x1f   :  { %752 = vmatpush3.bf16.msra.mxu1 %v808_v12  ;;  %v77_v46 = vpack.c.bf16 %v56_v44, %v55_v43  ;;  %v59_v49 = vld [vmem:[#allocation2 + $0xc0] sm:$0xff]  ;;  %v60_v50 = vld [vmem:[#allocation2 + $0xc8] sm:$0xff]  ;;  %v78_v51 = vpack.c.bf16 %v58_v48, %v57_v47  ;;  %v61_v53 = vld [vmem:[#allocation2 + $0xd0] sm:$0xff] }
  0x20   :  { %706 = vmatpush3.bf16.msra.mxu0 %v801_v3  ;;  %753 = vmatprep.subr.bf16.mxu1 %v809_v16  ;;  %v79_v52 = vpack.c.bf16 %v60_v50, %v59_v49  ;;  %v62_v54 = vld [vmem:[#allocation2 + $0xd8] sm:$0xff]  ;;  %v63_v55 = vld [vmem:[#allocation2 + $0xe0] sm:$0xff]  ;;  %v64_v56 = vld [vmem:[#allocation2 + $0xe8] sm:$0xff] }
  0x21   :  { %707 = vmatprep.subr.bf16.mxu0 %v802_v7  ;;  %v80_v57 = vpack.c.bf16 %v62_v54, %v61_v53  ;;  %v81_v58 = vpack.c.bf16 %v64_v56, %v63_v55  ;;  %v65_v59 = vld [vmem:[#allocation2 + $0xf0] sm:$0xff]  ;;  %v66_v60 = vld [vmem:[#allocation2 + $0xf8] sm:$0xff]  ;;  %v934_v0 = vld [vmem:[%s1135_s2] ss:$0 sm:$0xff] }
  0x22   :  { %v82_v61 = vpack.c.bf16 %v66_v60, %v65_v59  ;;  %v812_v62 = vld [vmem:[%s1136_s3 + $0x30] sm:$0xff]   ;;  %v813_v63 = vld [vmem:[%s1136_s3 + $0x38] sm:$0xff]  }
  0x23   :  { %754 = vmatpush3.bf16.msra.mxu1 %v809_v16 }
  0x24   :  { %708 = vmatpush3.bf16.msra.mxu0 %v802_v7  ;;  %755 = vmatprep.subr.bf16.mxu1 %v810_v21 }
  0x25   :  { %709 = vmatprep.subr.bf16.mxu0 %v803_v8 }
  0x27   :  { %756 = vmatpush3.bf16.msra.mxu1 %v810_v21 }
  0x28   :  { %710 = vmatpush3.bf16.msra.mxu0 %v803_v8  ;;  %757 = vmatprep.subr.bf16.mxu1 %v811_v24 }
  0x29   :  { %711 = vmatprep.subr.bf16.mxu0 %v804_v9 }
  0x2b   :  { %758 = vmatpush3.bf16.msra.mxu1 %v811_v24 }
  0x2c   :  { %712 = vmatpush3.bf16.msra.mxu0 %v804_v9  ;;  %759 = vmatprep.subr.bf16.mxu1 %v812_v62 }
  0x2d   :  { %713 = vmatprep.subr.bf16.mxu0 %v805_v13 }
  0x2f   :  { %760 = vmatpush3.bf16.msra.mxu1 %v812_v62 }
  0x30   :  { %714 = vmatpush3.bf16.msra.mxu0 %v805_v13  ;;  %761 = vmatprep.subr.bf16.mxu1 %v813_v63 }
  0x33   :  { %716 = vmatmul.mubr.bf16.vlgmr.msra.gmra.mrb[0].mxu0 %v68_v19  ;;  %762 = vmatpush3.bf16.msra.mxu1 %v813_v63 }
  0x34   :  { %719 = vmatprep.mubr.bf16.mxu0 %v69_v20 }
  0x3b   :  { %720 = vmatmul.mubr.bf16.gmra.mrb[4].mxu0 %v70_v27 }
  0x3c   :  { %723 = vmatprep.mubr.bf16.mxu0 %v71_v28 }
  0x43   :  { %724 = vmatmul.mubr.bf16.gmra.mrb[8].mxu0 %v72_v33 }
  0x44   :  { %727 = vmatprep.mubr.bf16.mxu0 %v73_v34 }
  0x4b   :  { %728 = vmatmul.mubr.bf16.gmra.mrb[12].mxu0 %v74_v39 }
  0x4c   :  { %731 = vmatprep.mubr.bf16.mxu0 %v75_v40 }
  0x53   :  { %732 = vmatmul.mubr.bf16.gmra.mrb[16].mxu0 %v76_v45 }
  0x54   :  { %735 = vmatprep.mubr.bf16.mxu0 %v77_v46 }
  0x5b   :  { %736 = vmatmul.mubr.bf16.gmra.mrb[20].mxu0 %v78_v51 }
  0x5c   :  { %739 = vmatprep.mubr.bf16.mxu0 %v79_v52 }
  0x63   :  { %740 = vmatmul.mubr.bf16.gmra.mrb[24].mxu0 %v80_v57 }
  0x64   :  { %743 = vmatprep.mubr.bf16.mxu0 %v81_v58 }
  0x6b   :  { %744 = vmatmul.mubr.bf16.gmra.mrb[28].mxu0 %v82_v61 }
 0x106   :  { %v717_v1 = vpop.f32.mrb[0].mxu0 }
 0x107   :  { %v197_v2 = vadd.f32 %v717_v1, %v934_v0  ;;  %v188_v3 = vpop.f32.mrb[1].mxu0 }
 0x108   :  { %v189_v4 = vadd.f32 %v934_v0, %v188_v3  ;;  %v718_v5 = vpop.f32.mrb[2].mxu0 }
 0x109   :  { %v200_v6 = vadd.f32 %v718_v5, %v934_v0  ;;  %v191_v7 = vpop.f32.mrb[3].mxu0  ;;  %v317_v9 = vmax.f32 %v197_v2, 0.0 }
 0x10a   :  { %v192_v8 = vadd.f32 %v934_v0, %v191_v7  ;;  %v315_v11 = vmax.f32 %v189_v4, 0.0 }
 0x10b   :  { %v318_v10 = vmax.f32 %v200_v6, 0.0 }
 0x10c   :  { %v316_v12 = vmax.f32 %v192_v8, 0.0 }
 0x10d   :  { %v348_v13 = vpack.c.bf16 %v318_v10, %v317_v9 }
 0x10e   :  { %v721_v14 = vpop.f32.mrb[4].mxu0  ;;  %v347_v15 = vpack.c.bf16 %v316_v12, %v315_v11 }
 0x10f   :  { %v213_v16 = vadd.f32 %v721_v14, %v934_v0  ;;  %v204_v17 = vpop.f32.mrb[5].mxu0 }
 0x110   :  { %v205_v18 = vadd.f32 %v934_v0, %v204_v17  ;;  %v722_v19 = vpop.f32.mrb[6].mxu0  ;;  %763 = vmatprep.mubr.bf16.mxu1 %v347_v15 }
 0x111   :  { %v216_v20 = vadd.f32 %v722_v19, %v934_v0  ;;  %v207_v21 = vpop.f32.mrb[7].mxu0  ;;  %764 = vmatmul.mubr.bf16.vlgmr.msra.gmra.mrb[0].mxu1 %v348_v13  ;;  %v321_v23 = vmax.f32 %v213_v16, 0.0 }
 0x112   :  { %v208_v22 = vadd.f32 %v934_v0, %v207_v21  ;;  %v319_v25 = vmax.f32 %v205_v18, 0.0 }
 0x113   :  { %v322_v24 = vmax.f32 %v216_v20, 0.0 }
 0x114   :  { %v320_v26 = vmax.f32 %v208_v22, 0.0 }
 0x115   :  { %v350_v27 = vpack.c.bf16 %v322_v24, %v321_v23 }
 0x116   :  { %v349_v28 = vpack.c.bf16 %v320_v26, %v319_v25  ;;  %v725_v29 = vpop.f32.mrb[8].mxu0 }
 0x117   :  { %v229_v30 = vadd.f32 %v725_v29, %v934_v0  ;;  %v220_v31 = vpop.f32.mrb[9].mxu0 }
 0x118   :  { %v221_v32 = vadd.f32 %v934_v0, %v220_v31  ;;  %v726_v33 = vpop.f32.mrb[10].mxu0  ;;  %767 = vmatprep.mubr.bf16.mxu1 %v349_v28 }
 0x119   :  { %v232_v34 = vadd.f32 %v726_v33, %v934_v0  ;;  %v223_v35 = vpop.f32.mrb[11].mxu0  ;;  %768 = vmatmul.mubr.bf16.gmra.mrb[4].mxu1 %v350_v27  ;;  %v325_v37 = vmax.f32 %v229_v30, 0.0 }
 0x11a   :  { %v224_v36 = vadd.f32 %v934_v0, %v223_v35  ;;  %v323_v39 = vmax.f32 %v221_v32, 0.0 }
 0x11b   :  { %v326_v38 = vmax.f32 %v232_v34, 0.0 }
 0x11c   :  { %v324_v40 = vmax.f32 %v224_v36, 0.0 }
 0x11d   :  { %v352_v41 = vpack.c.bf16 %v326_v38, %v325_v37 }
 0x11e   :  { %v351_v42 = vpack.c.bf16 %v324_v40, %v323_v39  ;;  %v729_v43 = vpop.f32.mrb[12].mxu0 }
 0x11f   :  { %v245_v44 = vadd.f32 %v729_v43, %v934_v0  ;;  %v236_v45 = vpop.f32.mrb[13].mxu0 }
 0x120   :  { %v237_v46 = vadd.f32 %v934_v0, %v236_v45  ;;  %v730_v47 = vpop.f32.mrb[14].mxu0  ;;  %771 = vmatprep.mubr.bf16.mxu1 %v351_v42 }
 0x121   :  { %v248_v48 = vadd.f32 %v730_v47, %v934_v0  ;;  %v239_v49 = vpop.f32.mrb[15].mxu0  ;;  %772 = vmatmul.mubr.bf16.gmra.mrb[8].mxu1 %v352_v41  ;;  %v329_v51 = vmax.f32 %v245_v44, 0.0 }
 0x122   :  { %v240_v50 = vadd.f32 %v934_v0, %v239_v49  ;;  %v327_v53 = vmax.f32 %v237_v46, 0.0 }
 0x123   :  { %v330_v52 = vmax.f32 %v248_v48, 0.0 }
 0x124   :  { %v328_v54 = vmax.f32 %v240_v50, 0.0  ;;  %v971_v50 = vld [vmem:[%s1137_s4] ss:$0 sm:$0xff] }
 0x125   :  { %v354_v55 = vpack.c.bf16 %v330_v52, %v329_v51 }
 0x126   :  { %v353_v56 = vpack.c.bf16 %v328_v54, %v327_v53  ;;  %v733_v57 = vpop.f32.mrb[16].mxu0 }
 0x127   :  { %v261_v58 = vadd.f32 %v733_v57, %v934_v0  ;;  %v252_v59 = vpop.f32.mrb[17].mxu0 }
 0x128   :  { %v253_v60 = vadd.f32 %v934_v0, %v252_v59  ;;  %v734_v61 = vpop.f32.mrb[18].mxu0  ;;  %775 = vmatprep.mubr.bf16.mxu1 %v353_v56 }
 0x129   :  { %v264_v62 = vadd.f32 %v734_v61, %v934_v0  ;;  %v255_v63 = vpop.f32.mrb[19].mxu0  ;;  %776 = vmatmul.mubr.bf16.gmra.mrb[12].mxu1 %v354_v55  ;;  %v333_v2 = vmax.f32 %v261_v58, 0.0 }
 0x12a   :  { %v256_v1 = vadd.f32 %v934_v0, %v255_v63  ;;  %v331_v4 = vmax.f32 %v253_v60, 0.0 }
 0x12b   :  { %v334_v3 = vmax.f32 %v264_v62, 0.0 }
 0x12c   :  { %v332_v5 = vmax.f32 %v256_v1, 0.0 }
 0x12d   :  { %v356_v6 = vpack.c.bf16 %v334_v3, %v333_v2 }
 0x12e   :  { %v355_v7 = vpack.c.bf16 %v332_v5, %v331_v4  ;;  %v737_v8 = vpop.f32.mrb[20].mxu0 }
 0x12f   :  { %v277_v9 = vadd.f32 %v737_v8, %v934_v0  ;;  %v268_v10 = vpop.f32.mrb[21].mxu0 }
 0x130   :  { %v269_v11 = vadd.f32 %v934_v0, %v268_v10  ;;  %v738_v12 = vpop.f32.mrb[22].mxu0  ;;  %779 = vmatprep.mubr.bf16.mxu1 %v355_v7 }
 0x131   :  { %v280_v13 = vadd.f32 %v738_v12, %v934_v0  ;;  %v271_v14 = vpop.f32.mrb[23].mxu0  ;;  %780 = vmatmul.mubr.bf16.gmra.mrb[16].mxu1 %v356_v6  ;;  %v337_v16 = vmax.f32 %v277_v9, 0.0 }
 0x132   :  { %v272_v15 = vadd.f32 %v934_v0, %v271_v14  ;;  %v335_v18 = vmax.f32 %v269_v11, 0.0 }
 0x133   :  { %v338_v17 = vmax.f32 %v280_v13, 0.0 }
 0x134   :  { %v336_v19 = vmax.f32 %v272_v15, 0.0 }
 0x135   :  { %v358_v20 = vpack.c.bf16 %v338_v17, %v337_v16 }
 0x136   :  { %v357_v21 = vpack.c.bf16 %v336_v19, %v335_v18  ;;  %v741_v22 = vpop.f32.mrb[24].mxu0 }
 0x137   :  { %v293_v23 = vadd.f32 %v741_v22, %v934_v0  ;;  %v284_v24 = vpop.f32.mrb[25].mxu0 }
 0x138   :  { %v285_v25 = vadd.f32 %v934_v0, %v284_v24  ;;  %v742_v26 = vpop.f32.mrb[26].mxu0  ;;  %783 = vmatprep.mubr.bf16.mxu1 %v357_v21 }
 0x139   :  { %v296_v27 = vadd.f32 %v742_v26, %v934_v0  ;;  %v287_v28 = vpop.f32.mrb[27].mxu0  ;;  %784 = vmatmul.mubr.bf16.gmra.mrb[20].mxu1 %v358_v20  ;;  %v341_v30 = vmax.f32 %v293_v23, 0.0 }
 0x13a   :  { %v288_v29 = vadd.f32 %v934_v0, %v287_v28  ;;  %v339_v32 = vmax.f32 %v285_v25, 0.0 }
 0x13b   :  { %v342_v31 = vmax.f32 %v296_v27, 0.0 }
 0x13c   :  { %v340_v33 = vmax.f32 %v288_v29, 0.0 }
 0x13d   :  { %v360_v34 = vpack.c.bf16 %v342_v31, %v341_v30 }
 0x13e   :  { %v359_v35 = vpack.c.bf16 %v340_v33, %v339_v32  ;;  %v745_v36 = vpop.f32.mrb[28].mxu0 }
 0x13f   :  { %v309_v37 = vadd.f32 %v745_v36, %v934_v0  ;;  %v300_v38 = vpop.f32.mrb[29].mxu0 }
 0x140   :  { %v301_v39 = vadd.f32 %v934_v0, %v300_v38  ;;  %v746_v40 = vpop.f32.mrb[30].mxu0  ;;  %787 = vmatprep.mubr.bf16.mxu1 %v359_v35 }
 0x141   :  { %v312_v41 = vadd.f32 %v746_v40, %v934_v0  ;;  %v303_v42 = vpop.f32.mrb[31].mxu0  ;;  %788 = vmatmul.mubr.bf16.gmra.mrb[24].mxu1 %v360_v34  ;;  %v345_v44 = vmax.f32 %v309_v37, 0.0 }
 0x142   :  { %v304_v43 = vadd.f32 %v934_v0, %v303_v42  ;;  %v343_v46 = vmax.f32 %v301_v39, 0.0 }
 0x143   :  { %v346_v45 = vmax.f32 %v312_v41, 0.0 }
 0x144   :  { %v344_v47 = vmax.f32 %v304_v43, 0.0 }
 0x145   :  { %v362_v48 = vpack.c.bf16 %v346_v45, %v345_v44 }
 0x146   :  { %v361_v49 = vpack.c.bf16 %v344_v47, %v343_v46 }
 0x148   :  { %791 = vmatprep.mubr.bf16.mxu1 %v361_v49 }
 0x149   :  { %792 = vmatmul.mubr.bf16.gmra.mrb[28].mxu1 %v362_v48 }
 0x1e4   :  { %v765_v51 = vpop.f32.mrb[0].mxu1 }
 0x1e5   :  { %v477_v52 = vadd.f32 %v765_v51, %v971_v50  ;;  %v468_v53 = vpop.f32.mrb[1].mxu1 }
 0x1e6   :  { %v469_v0 = vadd.f32 %v971_v50, %v468_v53  ;;  %v766_v54 = vpop.f32.mrb[2].mxu1 }
 0x1e7   :  { %598 = vst.msk [vmem:[%s1138_s5 + $0x10] sm:$0xff] %vm595_vm0, %v477_v52  ;;  %v480_v55 = vadd.f32 %v766_v54, %v971_v50  ;;  %v471_v56 = vpop.f32.mrb[3].mxu1 }
 0x1e8   :  { %596 = vst.msk [vmem:[%s1138_s5] sm:$0xff] %vm595_vm0, %v469_v0  ;;  %v472_v57 = vadd.f32 %v971_v50, %v471_v56 }
 0x1e9   :  { %599 = vst.msk [vmem:[%s1138_s5 + $0x18] sm:$0xff] %vm595_vm0, %v480_v55 }
 0x1ea   :  { %597 = vst.msk [vmem:[%s1138_s5 + $0x8] sm:$0xff] %vm595_vm0, %v472_v57 }
 0x1ec   :  { %v769_v58 = vpop.f32.mrb[4].mxu1 }
 0x1ed   :  { %v493_v59 = vadd.f32 %v769_v58, %v971_v50  ;;  %v484_v60 = vpop.f32.mrb[5].mxu1 }
 0x1ee   :  { %v485_v61 = vadd.f32 %v971_v50, %v484_v60  ;;  %v770_v62 = vpop.f32.mrb[6].mxu1 }
 0x1ef   :  { %602 = vst.msk [vmem:[%s1138_s5 + $0x30] sm:$0xff] %vm595_vm0, %v493_v59  ;;  %v496_v63 = vadd.f32 %v770_v62, %v971_v50  ;;  %v487_v1 = vpop.f32.mrb[7].mxu1 }
 0x1f0   :  { %600 = vst.msk [vmem:[%s1138_s5 + $0x20] sm:$0xff] %vm595_vm0, %v485_v61  ;;  %v488_v2 = vadd.f32 %v971_v50, %v487_v1 }
 0x1f1   :  { %603 = vst.msk [vmem:[%s1138_s5 + $0x38] sm:$0xff] %vm595_vm0, %v496_v63 }
 0x1f2   :  { %601 = vst.msk [vmem:[%s1138_s5 + $0x28] sm:$0xff] %vm595_vm0, %v488_v2 }
 0x1f4   :  { %v773_v3 = vpop.f32.mrb[8].mxu1 }
 0x1f5   :  { %v509_v4 = vadd.f32 %v773_v3, %v971_v50  ;;  %v500_v5 = vpop.f32.mrb[9].mxu1 }
 0x1f6   :  { %v501_v6 = vadd.f32 %v971_v50, %v500_v5  ;;  %v774_v7 = vpop.f32.mrb[10].mxu1 }
 0x1f7   :  { %606 = vst.msk [vmem:[%s1138_s5 + $0x50] sm:$0xff] %vm595_vm0, %v509_v4  ;;  %v512_v8 = vadd.f32 %v774_v7, %v971_v50  ;;  %v503_v9 = vpop.f32.mrb[11].mxu1 }
 0x1f8   :  { %604 = vst.msk [vmem:[%s1138_s5 + $0x40] sm:$0xff] %vm595_vm0, %v501_v6  ;;  %v504_v10 = vadd.f32 %v971_v50, %v503_v9 }
 0x1f9   :  { %607 = vst.msk [vmem:[%s1138_s5 + $0x58] sm:$0xff] %vm595_vm0, %v512_v8 }
 0x1fa   :  { %605 = vst.msk [vmem:[%s1138_s5 + $0x48] sm:$0xff] %vm595_vm0, %v504_v10 }
 0x1fc   :  { %v777_v11 = vpop.f32.mrb[12].mxu1 }
 0x1fd   :  { %v525_v12 = vadd.f32 %v777_v11, %v971_v50  ;;  %v516_v13 = vpop.f32.mrb[13].mxu1 }
 0x1fe   :  { %v517_v14 = vadd.f32 %v971_v50, %v516_v13  ;;  %v778_v15 = vpop.f32.mrb[14].mxu1 }
 0x1ff   :  { %610 = vst.msk [vmem:[%s1138_s5 + $0x70] sm:$0xff] %vm595_vm0, %v525_v12  ;;  %v528_v16 = vadd.f32 %v778_v15, %v971_v50  ;;  %v519_v17 = vpop.f32.mrb[15].mxu1 }
 0x200   :  { %608 = vst.msk [vmem:[%s1138_s5 + $0x60] sm:$0xff] %vm595_vm0, %v517_v14  ;;  %v520_v18 = vadd.f32 %v971_v50, %v519_v17 }
 0x201   :  { %611 = vst.msk [vmem:[%s1138_s5 + $0x78] sm:$0xff] %vm595_vm0, %v528_v16 }
 0x202   :  { %609 = vst.msk [vmem:[%s1138_s5 + $0x68] sm:$0xff] %vm595_vm0, %v520_v18 }
 0x204   :  { %v781_v19 = vpop.f32.mrb[16].mxu1 }
 0x205   :  { %v541_v20 = vadd.f32 %v781_v19, %v971_v50  ;;  %v532_v21 = vpop.f32.mrb[17].mxu1 }
 0x206   :  { %v533_v22 = vadd.f32 %v971_v50, %v532_v21  ;;  %v782_v23 = vpop.f32.mrb[18].mxu1 }
 0x207   :  { %614 = vst.msk [vmem:[%s1138_s5 + $0x90] sm:$0xff] %vm595_vm0, %v541_v20  ;;  %v544_v24 = vadd.f32 %v782_v23, %v971_v50  ;;  %v535_v25 = vpop.f32.mrb[19].mxu1 }
 0x208   :  { %612 = vst.msk [vmem:[%s1138_s5 + $0x80] sm:$0xff] %vm595_vm0, %v533_v22  ;;  %v536_v26 = vadd.f32 %v971_v50, %v535_v25 }
 0x209   :  { %615 = vst.msk [vmem:[%s1138_s5 + $0x98] sm:$0xff] %vm595_vm0, %v544_v24 }
 0x20a   :  { %613 = vst.msk [vmem:[%s1138_s5 + $0x88] sm:$0xff] %vm595_vm0, %v536_v26 }
 0x20c   :  { %v785_v27 = vpop.f32.mrb[20].mxu1 }
 0x20d   :  { %v557_v28 = vadd.f32 %v785_v27, %v971_v50  ;;  %v548_v29 = vpop.f32.mrb[21].mxu1 }
 0x20e   :  { %v549_v30 = vadd.f32 %v971_v50, %v548_v29  ;;  %v786_v31 = vpop.f32.mrb[22].mxu1 }
 0x20f   :  { %618 = vst.msk [vmem:[%s1138_s5 + $0xb0] sm:$0xff] %vm595_vm0, %v557_v28  ;;  %v560_v32 = vadd.f32 %v786_v31, %v971_v50  ;;  %v551_v33 = vpop.f32.mrb[23].mxu1 }
 0x210   :  { %616 = vst.msk [vmem:[%s1138_s5 + $0xa0] sm:$0xff] %vm595_vm0, %v549_v30  ;;  %v552_v34 = vadd.f32 %v971_v50, %v551_v33 }
 0x211   :  { %619 = vst.msk [vmem:[%s1138_s5 + $0xb8] sm:$0xff] %vm595_vm0, %v560_v32 }
 0x212   :  { %617 = vst.msk [vmem:[%s1138_s5 + $0xa8] sm:$0xff] %vm595_vm0, %v552_v34 }
 0x214   :  { %v789_v35 = vpop.f32.mrb[24].mxu1 }
 0x215   :  { %v573_v36 = vadd.f32 %v789_v35, %v971_v50  ;;  %v564_v37 = vpop.f32.mrb[25].mxu1 }
 0x216   :  { %v565_v38 = vadd.f32 %v971_v50, %v564_v37  ;;  %v790_v39 = vpop.f32.mrb[26].mxu1 }
 0x217   :  { %622 = vst.msk [vmem:[%s1138_s5 + $0xd0] sm:$0xff] %vm595_vm0, %v573_v36  ;;  %v576_v40 = vadd.f32 %v790_v39, %v971_v50  ;;  %v567_v41 = vpop.f32.mrb[27].mxu1 }
 0x218   :  { %620 = vst.msk [vmem:[%s1138_s5 + $0xc0] sm:$0xff] %vm595_vm0, %v565_v38  ;;  %v568_v42 = vadd.f32 %v971_v50, %v567_v41 }
 0x219   :  { %623 = vst.msk [vmem:[%s1138_s5 + $0xd8] sm:$0xff] %vm595_vm0, %v576_v40 }
 0x21a   :  { %621 = vst.msk [vmem:[%s1138_s5 + $0xc8] sm:$0xff] %vm595_vm0, %v568_v42 }
 0x21c   :  { %v793_v43 = vpop.f32.mrb[28].mxu1 }
 0x21d   :  { %v589_v44 = vadd.f32 %v793_v43, %v971_v50  ;;  %v580_v45 = vpop.f32.mrb[29].mxu1 }
 0x21e   :  { %v581_v46 = vadd.f32 %v971_v50, %v580_v45  ;;  %v794_v47 = vpop.f32.mrb[30].mxu1 }
 0x21f   :  { %626 = vst.msk [vmem:[%s1138_s5 + $0xf0] sm:$0xff] %vm595_vm0, %v589_v44  ;;  %v592_v48 = vadd.f32 %v794_v47, %v971_v50  ;;  %v583_v49 = vpop.f32.mrb[31].mxu1 }
 0x220   :  { %624 = vst.msk [vmem:[%s1138_s5 + $0xe0] sm:$0xff] %vm595_vm0, %v581_v46  ;;  %v584_v51 = vadd.f32 %v971_v50, %v583_v49 }
 0x221   :  { %627 = vst.msk [vmem:[%s1138_s5 + $0xf8] sm:$0xff] %vm595_vm0, %v592_v48 }
 0x222   :  { %625 = vst.msk [vmem:[%s1138_s5 + $0xe8] sm:$0xff] %vm595_vm0, %v584_v51 }
 0x223   :  { %632 = vsyncpa [#allocation3], 1 }

</bundles_post_ra>
